<compile_context>
chip_gen: v5e
topology: v5e:2x2
jax: 0.10.0
libtpu: 0.0.40
codegen_flags: <defaults>
</compile_context>

<pallas_src>
import jax
import jax.numpy as jnp
from jax.experimental import pallas as pl
from jax.experimental.pallas import tpu as pltpu


def _round_up(x, m):
    return (x + m - 1) // m * m


# -----------------------------------------------------------------------------
# One-time parameter preprocessing: bf16 weight cast + lane padding of `hidden`.
# -----------------------------------------------------------------------------
def prepare_kernel_params(params, *, lane=128):
    """Cast weights to bf16 and zero-pad the hidden dim to a multiple of 128.

    Call ONCE and cache the result (per-call .astype would add a full
    read+write of every weight each forward).  Zero padding is exact: padded
    hidden columns stay 0 through ReLU and contribute exact zeros to downstream
    dots.  `latent` is deliberately NOT padded: mu/logvar/z/kld already pack
    into a single 128-lane output slab, and padding latent would only bloat the
    HBM writeback of that slab.
    """
    din, hidden = params["w1"].shape
    hp = _round_up(hidden, lane)

    def pad_h(a, axis):
        widths = [(0, 0)] * a.ndim
        widths[axis] = (0, hp - hidden)
        return jnp.pad(a, widths)

    return {
        "w1": pad_h(params["w1"], 1).astype(jnp.bfloat16),   # (Din, Hp)
        "b1": pad_h(params["b1"], 1),                        # (1, Hp)   f32
        "w2": pad_h(params["w2"], 0).astype(jnp.bfloat16),   # (Hp, 2L)
        "b2": params["b2"],                                   # (1, 2L)   f32
        "w3": pad_h(params["w3"], 1).astype(jnp.bfloat16),   # (L, Hp)
        "b3": pad_h(params["b3"], 1),                        # (1, Hp)   f32
        "w4": pad_h(params["w4"], 0).astype(jnp.bfloat16),   # (Hp, Din)
        "b4": params["b4"],                                   # (1, Din)  f32
    }


# -----------------------------------------------------------------------------
# Fused forward: encoder MLP -> reparameterization (+kld) -> decoder MLP.
# One batch tile per grid step; all matmuls on the MXU in bf16 with f32 acc.
# -----------------------------------------------------------------------------
def bcvae_forward(x, eps, kparams, *, batch_tile=256, logits_dtype=jnp.float32):
    """x: (N, C, H, W) f32, eps: (N, latent) f32, kparams from prepare_kernel_params.

    Returns {'mu','logvar','z','kld','logits'} matching the PyTorch bcVAE forward."""
    N, C, H, W = x.shape
    Din = C * H * W
    latent = kparams["w3"].shape[0]
    Hp = kparams["w1"].shape[1]
    assert kparams["w1"].shape[0] == Din

    # Lane-dense stats slab: [mu | logvar | z | kld | zero pad] -> >= 128 lanes.
    SLAB = max(128, _round_up(3 * latent + 1, 128))

    # Batch tile: multiple of 8 sublanes, up to `batch_tile` rows per grid step.
    # Cap so the "parallel" batch axis has >= 2 steps when N allows, so both
    # TensorCores get work on v7x (no effect on single-TC v5e/v6e).
    TB = min(batch_tile, _round_up(N, 8))
    if N > 8 and (N + TB - 1) // TB < 2:
        TB = max(8, _round_up((N + 1) // 2, 8))
    N_pad = _round_up(N, TB)
    grid = (N_pad // TB,)

    # f32 inputs straight into the kernel (bf16 cast happens in-kernel, hidden
    # under MXU slack); pad the batch dim only when it doesn't divide.
    x_flat = x.reshape(N, Din)
    eps_p = eps
    if N_pad != N:
        x_flat = jnp.pad(x_flat, ((0, N_pad - N), (0, 0)))
        eps_p = jnp.pad(eps, ((0, N_pad - N), (0, 0)))

    w1, b1 = kparams["w1"], kparams["b1"]
    w2, b2 = kparams["w2"], kparams["b2"]
    w3, b3 = kparams["w3"], kparams["b3"]
    w4, b4 = kparams["w4"], kparams["b4"]

    def bcvae_kernel(x_ref, eps_ref, w1_ref, b1_ref, w2_ref, b2_ref,
                     w3_ref, b3_ref, w4_ref, b4_ref, stats_ref, logits_ref):
        # ---- encoder (bf16 MXU dots, f32 accumulation; x cast in-kernel) ----
        xb = x_ref[...].astype(jnp.bfloat16)                       # (TB, Din)
        h = jnp.dot(xb, w1_ref[...], preferred_element_type=jnp.float32) + b1_ref[...]
        h = jnp.maximum(h, 0.0)                                    # ReLU, f32
        dist = jnp.dot(h.astype(jnp.bfloat16), w2_ref[...],
                       preferred_element_type=jnp.float32) + b2_ref[...]
        mu = dist[:, :latent]                                      # in-register slice
        logvar = dist[:, latent:]

        # ---- bottleneck: reparameterization + per-sample kld (f32, VPU/EUP/XLU) ----
        std = jnp.exp(0.5 * logvar)
        z = mu + eps_ref[...] * std
        kld = -0.5 * jnp.sum(1.0 + logvar - mu * mu - jnp.exp(logvar),
                             axis=-1, keepdims=True)               # (TB, 1)

        # ---- decoder / "reconstructor" ----
        hd = jnp.dot(z.astype(jnp.bfloat16), w3_ref[...],
                     preferred_element_type=jnp.float32) + b3_ref[...]
        hd = jnp.maximum(hd, 0.0)
        logits = jnp.dot(hd.astype(jnp.bfloat16), w4_ref[...],
                         preferred_element_type=jnp.float32) + b4_ref[...]
        logits_ref[...] = logits.astype(logits_ref.dtype)

        # Lane-dense combined stats slab -> one unmasked full-width store.
        pieces = [mu, logvar, z, kld]
        pad_w = SLAB - (3 * latent + 1)
        if pad_w:
            pieces.append(jnp.zeros((mu.shape[0], pad_w), jnp.float32))
        stats_ref[...] = jnp.concatenate(pieces, axis=-1)

    def batch_spec(cols):
        return pl.BlockSpec((TB, cols), lambda i: (i, 0))

    def resident_spec(a):
        # Constant block index -> fetched once, stays resident across grid steps.
        # TODO(synk): pipeline_mode=pl.Buffered(1) would single-buffer these;
        # left out (weights < 1 MiB at these shapes) and the vmem budget below
        # conservatively accounts for double-buffered residents.
        return pl.BlockSpec(a.shape, lambda i: (0, 0))

    weights = (w1, b1, w2, b2, w3, b3, w4, b4)
    inputs = (x_flat, eps_p) + weights
    in_specs = [batch_spec(Din), batch_spec(latent)] + [resident_spec(a) for a in weights]

    out_shapes = (
        jax.ShapeDtypeStruct((N_pad, SLAB), jnp.float32),     # stats slab
        jax.ShapeDtypeStruct((N_pad, Din), logits_dtype),     # logits (flat)
    )
    out_specs = (batch_spec(SLAB), batch_spec(Din))

    # Explicit VMEM budget: double-buffered x/eps/stats/logits tiles plus
    # (conservatively) double-buffered resident weights, with headroom.  Floor
    # at 32 MiB (>= every generation's default scoped limit), cap at 64 MiB
    # (v7x physical VMEM per TC).
    itemsize_out = jnp.dtype(logits_dtype).itemsize
    tile_bytes = TB * (Din * 4 + latent * 4 + SLAB * 4 + Din * itemsize_out)
    weight_bytes = sum(int(a.size) * a.dtype.itemsize for a in weights)
    vmem_limit = min(max(int(2 * (tile_bytes + weight_bytes) * 1.25) + (2 << 20),
                         32 * 1024 * 1024),
                     64 * 1024 * 1024)

    flops = 2 * N_pad * Hp * (2 * Din + 3 * latent)
    bytes_accessed = (N_pad * Din * 4 + N_pad * latent * 4 + weight_bytes
                      + N_pad * SLAB * 4 + N_pad * Din * itemsize_out)
    cost = pl.CostEstimate(flops=int(flops),
                           transcendentals=int(2 * N_pad * latent),
                           bytes_accessed=int(bytes_accessed))

    stats, logits_flat = pl.pallas_call(
        bcvae_kernel,
        grid=grid,
        in_specs=in_specs,
        out_specs=out_specs,
        out_shape=out_shapes,
        compiler_params=pltpu.CompilerParams(
            dimension_semantics=("parallel",),
            vmem_limit_bytes=vmem_limit),
        cost_estimate=cost,
    )(*inputs)

    mu = stats[:N, 0:latent]
    logvar = stats[:N, latent:2 * latent]
    z = stats[:N, 2 * latent:3 * latent]
    kld = stats[:N, 3 * latent:3 * latent + 1]
    logits = logits_flat[:N].reshape(N, C, H, W)
    return {"mu": mu, "logvar": logvar, "z": z, "kld": kld, "logits": logits}


# -----------------------------------------------------------------------------
# Deterministic parameter construction (synthetic, no checkpoint load).
# -----------------------------------------------------------------------------
def make_params(key, din, hidden, latent):
    ks = jax.random.split(key, 8)
    scale = lambda fan_in: 1.0 / jnp.sqrt(jnp.float32(fan_in))
    return {
        "w1": jax.random.normal(ks[0], (din, hidden), jnp.float32) * scale(din),
        "b1": jax.random.normal(ks[1], (1, hidden), jnp.float32) * 0.01,
        "w2": jax.random.normal(ks[2], (hidden, 2 * latent), jnp.float32) * scale(hidden),
        "b2": jax.random.normal(ks[3], (1, 2 * latent), jnp.float32) * 0.01,
        "w3": jax.random.normal(ks[4], (latent, hidden), jnp.float32) * scale(latent),
        "b3": jax.random.normal(ks[5], (1, hidden), jnp.float32) * 0.01,
        "w4": jax.random.normal(ks[6], (hidden, din), jnp.float32) * scale(hidden),
        "b4": jax.random.normal(ks[7], (1, din), jnp.float32) * 0.01,
    }


def bcvae_reference(x, eps, params):
    """Pure-JAX reference with the same mixed precision (bf16 matmuls, f32 acc)."""
    N, C, H, W = x.shape
    latent = params["w3"].shape[0]

    def dot_bf16(a, w):
        return jax.lax.dot(a.astype(jnp.bfloat16), w.astype(jnp.bfloat16),
                           preferred_element_type=jnp.float32)

    xf = x.reshape(N, -1)
    h = jnp.maximum(dot_bf16(xf, params["w1"]) + params["b1"], 0.0)
    dist = dot_bf16(h, params["w2"]) + params["b2"]
    mu, logvar = dist[:, :latent], dist[:, latent:]
    z = mu + eps * jnp.exp(0.5 * logvar)
    kld = -0.5 * jnp.sum(1.0 + logvar - mu * mu - jnp.exp(logvar),
                         axis=-1, keepdims=True)
    hd = jnp.maximum(dot_bf16(z, params["w3"]) + params["b3"], 0.0)
    logits = (dot_bf16(hd, params["w4"]) + params["b4"]).reshape(N, C, H, W)
    return {"mu": mu, "logvar": logvar, "z": z, "kld": kld, "logits": logits}


if __name__ == "__main__":
    # Small shapes consistent with the module's forward.
    N, C, H, W = 2, 4, 16, 16
    hidden, latent = 32, 8
    din = C * H * W

    key = jax.random.PRNGKey(0)
    k_x, k_eps, k_p = jax.random.split(key, 3)

    x = jax.random.normal(k_x, (N, C, H, W), jnp.float32)
    eps = jax.random.normal(k_eps, (N, latent), jnp.float32)  # reparam noise
    params = make_params(k_p, din, hidden, latent)

    # One-time weight preprocessing (bf16 cast + hidden lane padding); cached
    # and reused across forward calls.
    kparams = prepare_kernel_params(params)
    kparams = jax.tree_util.tree_map(jax.block_until_ready, kparams)

    out = bcvae_forward(x, eps, kparams)
    out = jax.tree_util.tree_map(jax.block_until_ready, out)

    ref = bcvae_reference(x, eps, params)
    for name in ("mu", "logvar", "z", "kld", "logits"):
        assert out[name].shape == ref[name].shape, name
        assert jnp.allclose(out[name], ref[name], atol=2e-3, rtol=2e-3), name

    print("KERNEL_OK")
</pallas_src>

<mosaic_0001>
module attributes {stable_mosaic.version = 11 : i64} {
  func.func @bcvae_kernel(%arg0: i32, %arg1: memref<8x1024xf32, #tpu.memory_space<vmem>>, %arg2: memref<8x8xf32, #tpu.memory_space<vmem>>, %arg3: memref<1024x128xbf16, #tpu.memory_space<vmem>>, %arg4: memref<1x128xf32, #tpu.memory_space<vmem>>, %arg5: memref<128x16xbf16, #tpu.memory_space<vmem>>, %arg6: memref<1x16xf32, #tpu.memory_space<vmem>>, %arg7: memref<8x128xbf16, #tpu.memory_space<vmem>>, %arg8: memref<1x128xf32, #tpu.memory_space<vmem>>, %arg9: memref<128x1024xbf16, #tpu.memory_space<vmem>>, %arg10: memref<1x1024xf32, #tpu.memory_space<vmem>>, %arg11: memref<8x128xf32, #tpu.memory_space<vmem>>, %arg12: memref<8x1024xf32, #tpu.memory_space<vmem>>) attributes {dimension_semantics = [#tpu.dimension_semantics<parallel>], iteration_bounds = array<i64: 1>, scalar_prefetch = 0 : i64, scratch_operands = 0 : i64, tpu.core_type = #tpu.core_type<tc>, window_params = [{transform_indices = @transform_0, window_bounds = array<i64: 8, 1024>}, {transform_indices = @transform_1, window_bounds = array<i64: 8, 8>}, {pipeline_mode = #tpu.pipeline_mode<synchronous>, transform_indices = @transform_2, window_bounds = array<i64: 1024, 128>}, {pipeline_mode = #tpu.pipeline_mode<synchronous>, transform_indices = @transform_3, window_bounds = array<i64: 1, 128>}, {pipeline_mode = #tpu.pipeline_mode<synchronous>, transform_indices = @transform_4, window_bounds = array<i64: 128, 16>}, {pipeline_mode = #tpu.pipeline_mode<synchronous>, transform_indices = @transform_5, window_bounds = array<i64: 1, 16>}, {pipeline_mode = #tpu.pipeline_mode<synchronous>, transform_indices = @transform_6, window_bounds = array<i64: 8, 128>}, {pipeline_mode = #tpu.pipeline_mode<synchronous>, transform_indices = @transform_7, window_bounds = array<i64: 1, 128>}, {pipeline_mode = #tpu.pipeline_mode<synchronous>, transform_indices = @transform_8, window_bounds = array<i64: 128, 1024>}, {pipeline_mode = #tpu.pipeline_mode<synchronous>, transform_indices = @transform_9, window_bounds = array<i64: 1, 1024>}, {transform_indices = @transform_10, window_bounds = array<i64: 8, 128>}, {transform_indices = @transform_11, window_bounds = array<i64: 8, 1024>}]} {
    %c0 = arith.constant 0 : index
    %c0_0 = arith.constant 0 : index
    %0 = vector.load %arg1[%c0, %c0_0] : memref<8x1024xf32, #tpu.memory_space<vmem>>, vector<8x1024xf32>
    %1 = arith.truncf %0 : vector<8x1024xf32> to vector<8x1024xbf16>
    %c0_1 = arith.constant 0 : index
    %c0_2 = arith.constant 0 : index
    %2 = vector.load %arg3[%c0_1, %c0_2] : memref<1024x128xbf16, #tpu.memory_space<vmem>>, vector<1024x128xbf16>
    %cst = arith.constant dense<0.000000e+00> : vector<8x128xf32>
    %3 = tpu.matmul %1, %2, %cst {dimension_numbers = #tpu.dot_dimension_numbers<[1], [0], [0], [1], [0, 0, 1, 1], [], []>} : vector<8x1024xbf16>, vector<1024x128xbf16>, vector<8x128xf32> -> vector<8x128xf32>
    %c0_3 = arith.constant 0 : index
    %c0_4 = arith.constant 0 : index
    %4 = vector.load %arg4[%c0_3, %c0_4] : memref<1x128xf32, #tpu.memory_space<vmem>>, vector<1x128xf32>
    %5 = vector.broadcast %4 : vector<1x128xf32> to vector<8x128xf32>
    %6 = arith.addf %3, %5 : vector<8x128xf32>
    %cst_5 = arith.constant 0.000000e+00 : f32
    %7 = vector.broadcast %cst_5 : f32 to vector<8x128xf32>
    %8 = arith.maximumf %6, %7 : vector<8x128xf32>
    %9 = arith.truncf %8 : vector<8x128xf32> to vector<8x128xbf16>
    %c0_6 = arith.constant 0 : index
    %c0_7 = arith.constant 0 : index
    %10 = vector.load %arg5[%c0_6, %c0_7] : memref<128x16xbf16, #tpu.memory_space<vmem>>, vector<128x16xbf16>
    %cst_8 = arith.constant dense<0.000000e+00> : vector<8x16xf32>
    %11 = tpu.matmul %9, %10, %cst_8 {dimension_numbers = #tpu.dot_dimension_numbers<[1], [0], [0], [1], [0, 0, 1, 1], [], []>} : vector<8x128xbf16>, vector<128x16xbf16>, vector<8x16xf32> -> vector<8x16xf32>
    %c0_9 = arith.constant 0 : index
    %c0_10 = arith.constant 0 : index
    %12 = vector.load %arg6[%c0_9, %c0_10] : memref<1x16xf32, #tpu.memory_space<vmem>>, vector<1x16xf32>
    %13 = vector.broadcast %12 : vector<1x16xf32> to vector<8x16xf32>
    %14 = arith.addf %11, %13 : vector<8x16xf32>
    %15 = vector.extract_strided_slice %14 {offsets = [0, 0], sizes = [8, 8], strides = [1, 1]} : vector<8x16xf32> to vector<8x8xf32>
    %16 = vector.extract_strided_slice %14 {offsets = [0, 8], sizes = [8, 8], strides = [1, 1]} : vector<8x16xf32> to vector<8x8xf32>
    %cst_11 = arith.constant 5.000000e-01 : f32
    %17 = vector.broadcast %cst_11 : f32 to vector<8x8xf32>
    %18 = arith.mulf %17, %16 : vector<8x8xf32>
    %19 = math.exp %18 : vector<8x8xf32>
    %c0_12 = arith.constant 0 : index
    %c0_13 = arith.constant 0 : index
    %20 = vector.load %arg2[%c0_12, %c0_13] : memref<8x8xf32, #tpu.memory_space<vmem>>, vector<8x8xf32>
    %21 = arith.mulf %20, %19 : vector<8x8xf32>
    %22 = arith.addf %15, %21 : vector<8x8xf32>
    %cst_14 = arith.constant 1.000000e+00 : f32
    %23 = vector.broadcast %cst_14 : f32 to vector<8x8xf32>
    %24 = arith.addf %23, %16 : vector<8x8xf32>
    %25 = arith.mulf %15, %15 : vector<8x8xf32>
    %26 = arith.subf %24, %25 : vector<8x8xf32>
    %27 = math.exp %16 : vector<8x8xf32>
    %28 = arith.subf %26, %27 : vector<8x8xf32>
    %cst_15 = arith.constant dense<0.000000e+00> : vector<8xf32>
    %29 = vector.multi_reduction <add>, %28, %cst_15 [1] : vector<8x8xf32> to vector<8xf32>
    %30 = vector.shape_cast %29 : vector<8xf32> to vector<8x1xf32>
    %cst_16 = arith.constant -5.000000e-01 : f32
    %31 = vector.broadcast %cst_16 : f32 to vector<8x1xf32>
    %32 = arith.mulf %31, %30 : vector<8x1xf32>
    %33 = arith.truncf %22 : vector<8x8xf32> to vector<8x8xbf16>
    %c0_17 = arith.constant 0 : index
    %c0_18 = arith.constant 0 : index
    %34 = vector.load %arg7[%c0_17, %c0_18] : memref<8x128xbf16, #tpu.memory_space<vmem>>, vector<8x128xbf16>
    %cst_19 = arith.constant dense<0.000000e+00> : vector<8x128xf32>
    %35 = tpu.matmul %33, %34, %cst_19 {dimension_numbers = #tpu.dot_dimension_numbers<[1], [0], [0], [1], [0, 0, 1, 1], [], []>} : vector<8x8xbf16>, vector<8x128xbf16>, vector<8x128xf32> -> vector<8x128xf32>
    %c0_20 = arith.constant 0 : index
    %c0_21 = arith.constant 0 : index
    %36 = vector.load %arg8[%c0_20, %c0_21] : memref<1x128xf32, #tpu.memory_space<vmem>>, vector<1x128xf32>
    %37 = vector.broadcast %36 : vector<1x128xf32> to vector<8x128xf32>
    %38 = arith.addf %35, %37 : vector<8x128xf32>
    %cst_22 = arith.constant 0.000000e+00 : f32
    %39 = vector.broadcast %cst_22 : f32 to vector<8x128xf32>
    %40 = arith.maximumf %38, %39 : vector<8x128xf32>
    %41 = arith.truncf %40 : vector<8x128xf32> to vector<8x128xbf16>
    %c0_23 = arith.constant 0 : index
    %c0_24 = arith.constant 0 : index
    %42 = vector.load %arg9[%c0_23, %c0_24] : memref<128x1024xbf16, #tpu.memory_space<vmem>>, vector<128x1024xbf16>
    %cst_25 = arith.constant dense<0.000000e+00> : vector<8x1024xf32>
    %43 = tpu.matmul %41, %42, %cst_25 {dimension_numbers = #tpu.dot_dimension_numbers<[1], [0], [0], [1], [0, 0, 1, 1], [], []>} : vector<8x128xbf16>, vector<128x1024xbf16>, vector<8x1024xf32> -> vector<8x1024xf32>
    %c0_26 = arith.constant 0 : index
    %c0_27 = arith.constant 0 : index
    %44 = vector.load %arg10[%c0_26, %c0_27] : memref<1x1024xf32, #tpu.memory_space<vmem>>, vector<1x1024xf32>
    %45 = vector.broadcast %44 : vector<1x1024xf32> to vector<8x1024xf32>
    %46 = arith.addf %43, %45 : vector<8x1024xf32>
    %c0_28 = arith.constant 0 : index
    %c0_29 = arith.constant 0 : index
    %47 = vector.load %arg12[%c0_28, %c0_29] : memref<8x1024xf32, #tpu.memory_space<vmem>>, vector<8x1024xf32>
    tpu.vector_store %arg12[%c0_28, %c0_29], %46 {strides = array<i32>} : memref<8x1024xf32, #tpu.memory_space<vmem>>, vector<8x1024xf32>,
    %cst_30 = arith.constant 0.000000e+00 : f32
    %48 = vector.broadcast %cst_30 : f32 to vector<8x103xf32>
    %49 = tpu.concatenate %15, %16, %22, %32, %48 in 1 : vector<8x8xf32>, vector<8x8xf32>, vector<8x8xf32>, vector<8x1xf32>, vector<8x103xf32> -> vector<8x128xf32>
    %c0_31 = arith.constant 0 : index
    %c0_32 = arith.constant 0 : index
    %50 = vector.load %arg11[%c0_31, %c0_32] : memref<8x128xf32, #tpu.memory_space<vmem>>, vector<8x128xf32>
    tpu.vector_store %arg11[%c0_31, %c0_32], %49 {strides = array<i32>} : memref<8x128xf32, #tpu.memory_space<vmem>>, vector<8x128xf32>,
    return
  }
  func.func @transform_0(%arg0: i32) -> (i32, i32) {
    %c0_i32 = arith.constant 0 : i32
    %c0_i32_0 = arith.constant 0 : i32
    return %arg0, %c0_i32 : i32, i32
  }
  func.func @transform_1(%arg0: i32) -> (i32, i32) {
    %c0_i32 = arith.constant 0 : i32
    %c0_i32_0 = arith.constant 0 : i32
    return %arg0, %c0_i32 : i32, i32
  }
  func.func @transform_2(%arg0: i32) -> (i32, i32) {
    %c0_i32 = arith.constant 0 : i32
    %c0_i32_0 = arith.constant 0 : i32
    %c0_i32_1 = arith.constant 0 : i32
    return %c0_i32, %c0_i32_0 : i32, i32
  }
  func.func @transform_3(%arg0: i32) -> (i32, i32) {
    %c0_i32 = arith.constant 0 : i32
    %c0_i32_0 = arith.constant 0 : i32
    %c0_i32_1 = arith.constant 0 : i32
    return %c0_i32, %c0_i32_0 : i32, i32
  }
  func.func @transform_4(%arg0: i32) -> (i32, i32) {
    %c0_i32 = arith.constant 0 : i32
    %c0_i32_0 = arith.constant 0 : i32
    %c0_i32_1 = arith.constant 0 : i32
    return %c0_i32, %c0_i32_0 : i32, i32
  }
  func.func @transform_5(%arg0: i32) -> (i32, i32) {
    %c0_i32 = arith.constant 0 : i32
    %c0_i32_0 = arith.constant 0 : i32
    %c0_i32_1 = arith.constant 0 : i32
    return %c0_i32, %c0_i32_0 : i32, i32
  }
  func.func @transform_6(%arg0: i32) -> (i32, i32) {
    %c0_i32 = arith.constant 0 : i32
    %c0_i32_0 = arith.constant 0 : i32
    %c0_i32_1 = arith.constant 0 : i32
    return %c0_i32, %c0_i32_0 : i32, i32
  }
  func.func @transform_7(%arg0: i32) -> (i32, i32) {
    %c0_i32 = arith.constant 0 : i32
    %c0_i32_0 = arith.constant 0 : i32
    %c0_i32_1 = arith.constant 0 : i32
    return %c0_i32, %c0_i32_0 : i32, i32
  }
  func.func @transform_8(%arg0: i32) -> (i32, i32) {
    %c0_i32 = arith.constant 0 : i32
    %c0_i32_0 = arith.constant 0 : i32
    %c0_i32_1 = arith.constant 0 : i32
    return %c0_i32, %c0_i32_0 : i32, i32
  }
  func.func @transform_9(%arg0: i32) -> (i32, i32) {
    %c0_i32 = arith.constant 0 : i32
    %c0_i32_0 = arith.constant 0 : i32
    %c0_i32_1 = arith.constant 0 : i32
    return %c0_i32, %c0_i32_0 : i32, i32
  }
  func.func @transform_10(%arg0: i32) -> (i32, i32) {
    %c0_i32 = arith.constant 0 : i32
    %c0_i32_0 = arith.constant 0 : i32
    return %arg0, %c0_i32 : i32, i32
  }
  func.func @transform_11(%arg0: i32) -> (i32, i32) {
    %c0_i32 = arith.constant 0 : i32
    %c0_i32_0 = arith.constant 0 : i32
    return %arg0, %c0_i32 : i32, i32
  }
}

</mosaic_0001>

<bundles_post_ra>
// kernel: tpu_custom_call.1
= control target key start
LH: loop header
LB: loop body
LE: loop exit
PB: predicated region body
PF: predicated region fallthrough
CT: control target
= control target key end

     0   :  { %17 = vsyncpa [#allocation3], 0  ;;  %s2536_s0 = inlined_call_operand.vmem [shape: f32[8,1024], index: 0, kind: input, shape index: {}]   ;;  %s2537_s1 = inlined_call_operand.vmem [shape: f32[8,8], index: 1, kind: input, shape index: {}]   ;;  %s2538_s2 = inlined_call_operand.hbm [shape: bf16[1024,128], index: 2, kind: input, shape index: {}]   ;;  %s2539_s3 = inlined_call_operand.hbm [shape: f32[1,128], index: 3, kind: input, shape index: {}]   ;;  %s2540_s4 = inlined_call_operand.vmem [shape: bf16[128,16], index: 4, kind: input, shape index: {}]   ;;  %s2541_s5 = inlined_call_operand.hbm [shape: f32[1,16], index: 5, kind: input, shape index: {}]   ;;  %s2542_s6 = inlined_call_operand.hbm [shape: bf16[8,128], index: 6, kind: input, shape index: {}]   ;;  %s2543_s7 = inlined_call_operand.hbm [shape: f32[1,128], index: 7, kind: input, shape index: {}]   ;;  %s2544_s8 = inlined_call_operand.hbm [shape: bf16[128,1024], index: 8, kind: input, shape index: {}]   ;;  %s2545_s9 = inlined_call_operand.vmem [shape: f32[1,1024], index: 9, kind: input, shape index: {}]   ;;  %s2546_s10 = inlined_call_operand.hbm [shape: f32[8,128], index: 10, kind: output, shape index: {0}]   ;;  %s2547_s11 = inlined_call_operand.hbm [shape: f32[8,1024], index: 11, kind: output, shape index: {1}]  }
   0x1   :  { %18 = vsyncpa [#allocation6], 0 }
   0x2   :  { %19 = vsyncpa [#allocation9], 0 }
   0x3   :  { %20 = vsyncpa [#allocation12], 0 }
   0x4   :  { %21 = vsyncpa [#allocation4], 0  ;;  %s45_s19 = sshll.u32 %s2539_s3, 4  ;;  %s46_s19 = int_to_ptr.hbm [resolvable:$true] %s45_s19 }
   0x5   :  { %22 = vsyncpa [#allocation15], 0  ;;  %s2370_s20 = smov [#allocation5]   ;;  %s69_s24 = sshll.u32 %s2542_s6, 4  ;;  %s70_s24 = int_to_ptr.hbm [resolvable:$true] %s69_s24 }
   0x6   :  { %s47_s21 = sshll.u32 %s2370_s20, 4  ;;  %s2371_s25 = smov [#allocation8]   ;;  %s48_s21 = int_to_ptr.vmem [resolvable:$true] %s47_s21 }
   0x7   :  { %50 = dma.hbm_to_vmem [thread:$0]  %s46_s19, 16, %s48_s21, [#allocation6]  }
   0x8   :  { %s71_s26 = sshll.u32 %s2371_s25, 4  ;;  %s31_s29 = sshll.u32 %s2538_s2, 4  ;;  %s72_s26 = int_to_ptr.vmem [resolvable:$true] %s71_s26  ;;  %s32_s29 = int_to_ptr.hbm [resolvable:$true] %s31_s29 }
   0x9   :  { %74 = dma.hbm_to_vmem [thread:$0]  %s70_s24, 64, %s72_s26, [#allocation9]  }
   0xa   :  { %s2372_s3 = smov [#allocation2]   ;;  %s58_s14 = sshll.u32 %s2541_s5, 4  ;;  %s59_s14 = int_to_ptr.hbm [resolvable:$true] %s58_s14 }
   0xb   :  { %s33_s30 = sshll.u32 %s2372_s3, 4  ;;  %s2373_s15 = smov 64   ;;  %s34_s30 = int_to_ptr.vmem [resolvable:$true] %s33_s30 }
   0xc   :  { %s2374_s6 = smov 4   ;;  %s2375_s16 = smov [#allocation7]  }
   0xd   :  { %39 = dma.hbm_to_vmem [thread:$0]  %s32_s29, 8192, %s34_s30, [#allocation3], %s2373_s15, %s2373_s15, %s2374_s6  }
   0xe   :  { %s60_s17 = sshll.u32 %s2375_s16, 4  ;;  %s80_s2 = sshll.u32 %s2543_s7, 4  ;;  %s61_s17 = int_to_ptr.vmem [resolvable:$true] %s60_s17  ;;  %s81_s2 = int_to_ptr.hbm [resolvable:$true] %s80_s2 }
   0xf   :  { %63 = dma.hbm_to_vmem [thread:$0]  %s59_s14, 16, %s61_s17, [#allocation6]  }
  0x10   :  { %s90_s22 = sshll.u32 %s2544_s8, 4  ;;  %s2376_s23 = smov [#allocation10]   ;;  %s91_s22 = int_to_ptr.hbm [resolvable:$true] %s90_s22 }
  0x11   :  { %s82_s24 = sshll.u32 %s2376_s23, 4  ;;  %s2377_s5 = smov [#allocation11]   ;;  %s83_s24 = int_to_ptr.vmem [resolvable:$true] %s82_s24 }
  0x12   :  { %85 = dma.hbm_to_vmem [thread:$0]  %s81_s2, 16, %s83_s24, [#allocation9]  }
  0x13   :  { %s92_s25 = sshll.u32 %s2377_s5, 4  ;;  %s2378_s26 = smov 512   ;;  %s93_s25 = int_to_ptr.vmem [resolvable:$true] %s92_s25 }
  0x14   :  { %s2379_s27 = smov 32  }
  0x15   :  { %98 = dma.hbm_to_vmem [thread:$0]  %s91_s22, 8192, %s93_s25, [#allocation12], %s2378_s26, %s2378_s26, %s2379_s27  }
  0x16   :  { %2358 = dma.done.wait [#allocation3], 8192  }
  0x17   :  { %2359 = vsyncadd [#allocation3], 4294959104 }
  0x18   :  { %2360 = dma.done.wait [#allocation6], 32  }
  0x19   :  { %2361 = vsyncadd [#allocation6], 4294967264 }
  0x1a   :  { %2362 = dma.done.wait [#allocation9], 80  }
  0x1b   :  { %2363 = vsyncadd [#allocation9], 4294967216 }
  0x1c   :  { %2364 = dma.done.wait [#allocation12], 8192  }
  0x1d   :  { %2365 = vsyncadd [#allocation12], 4294959104  ;;  %v2015_v0 = vld [vmem:[#allocation2 + $0x38] sm:$0xff]  ;;  %v2014_v4 = vld [vmem:[#allocation2 + $0x30] sm:$0xff]  ;;  %vm883_vm0 = vcmask 1043456   ;;  %s2381_s12 = smov 8  }
  0x1e   :  { %v2023_v1 = vld [vmem:[#allocation2 + $0x78] sm:$0xff]  ;;  %658 = vmatpush.bf16.msra.mxu0 %v2015_v0  ;;  %v2022_v5 = vld [vmem:[#allocation2 + $0x70] sm:$0xff]  ;;  %v2013_v8 = vld [vmem:[#allocation2 + $0x28] sm:$0xff]  ;;  %vm869_vm1 = vcmask 64512   ;;  %s2382_s15 = smov 16   ;;  %vm1420_vm2 = vcmask 130048  }
  0x1f   :  { %v2031_v2 = vld [vmem:[#allocation2 + $0xb8] sm:$0xff]  ;;  %671 = vmatpush.bf16.msra.mxu1 %v2023_v1  ;;  %v2030_v6 = vld [vmem:[#allocation2 + $0xb0] sm:$0xff]  ;;  %v2021_v9 = vld [vmem:[#allocation2 + $0x68] sm:$0xff]  ;;  %vm1422_vm3 = vcmask 195584   ;;  %s1434_s18 = sshll.u32 %s2546_s10, 4  ;;  %vm1424_vm4 = vcmask 203776   ;;  %s1435_s18 = int_to_ptr.hbm [resolvable:$true] %s1434_s18 }
  0x20   :  { %v2039_v3 = vld [vmem:[#allocation2 + $0xf8] sm:$0xff]  ;;  %684 = vmatpush.bf16.msra.mxu2 %v2031_v2  ;;  %v2038_v7 = vld [vmem:[#allocation2 + $0xf0] sm:$0xff]  ;;  %v2029_v10 = vld [vmem:[#allocation2 + $0xa8] sm:$0xff]  ;;  %s1445_s22 = sshll.u32 %s2547_s11, 4  ;;  %s1446_s22 = int_to_ptr.hbm [resolvable:$true] %s1445_s22 }
  0x21   :  { %697 = vmatpush.bf16.msra.mxu3 %v2039_v3  ;;  %v2037_v11 = vld [vmem:[#allocation2 + $0xe8] sm:$0xff]  ;;  %v2012_v12 = vld [vmem:[#allocation2 + $0x20] sm:$0xff]  ;;  %v2011_v16 = vld [vmem:[#allocation2 + $0x18] sm:$0xff] }
  0x22   :  { %659 = vmatpush.bf16.msra.mxu0 %v2014_v4  ;;  %v2020_v13 = vld [vmem:[#allocation2 + $0x60] sm:$0xff]  ;;  %v2019_v17 = vld [vmem:[#allocation2 + $0x58] sm:$0xff]  ;;  %v2010_v20 = vld [vmem:[#allocation2 + $0x10] sm:$0xff] }
  0x23   :  { %672 = vmatpush.bf16.msra.mxu1 %v2022_v5  ;;  %v2028_v14 = vld [vmem:[#allocation2 + $0xa0] sm:$0xff]  ;;  %v2027_v18 = vld [vmem:[#allocation2 + $0x98] sm:$0xff]  ;;  %v2018_v21 = vld [vmem:[#allocation2 + $0x50] sm:$0xff] }
  0x24   :  { %685 = vmatpush.bf16.msra.mxu2 %v2030_v6  ;;  %v2036_v15 = vld [vmem:[#allocation2 + $0xe0] sm:$0xff]  ;;  %v2035_v19 = vld [vmem:[#allocation2 + $0xd8] sm:$0xff]  ;;  %v2026_v22 = vld [vmem:[#allocation2 + $0x90] sm:$0xff] }
  0x25   :  { %698 = vmatpush.bf16.msra.mxu3 %v2038_v7  ;;  %v2034_v23 = vld [vmem:[#allocation2 + $0xd0] sm:$0xff]  ;;  %v2009_v24 = vld [vmem:[#allocation2 + $0x8] sm:$0xff]  ;;  %v2008_v28 = vld [vmem:[#allocation2] sm:$0xff] }
  0x26   :  { %660 = vmatpush.bf16.msra.mxu0 %v2013_v8  ;;  %v2017_v25 = vld [vmem:[#allocation2 + $0x48] sm:$0xff]  ;;  %v2016_v29 = vld [vmem:[#allocation2 + $0x40] sm:$0xff]  ;;  %v2047_v32 = vld [vmem:[#allocation2 + $0x138] sm:$0xff] }
  0x27   :  { %673 = vmatpush.bf16.msra.mxu1 %v2021_v9  ;;  %v2025_v26 = vld [vmem:[#allocation2 + $0x88] sm:$0xff]  ;;  %v2024_v30 = vld [vmem:[#allocation2 + $0x80] sm:$0xff]  ;;  %v128_v33 = vld [vmem:[%s2536_s0 + $0x10] sm:$0xff] }
  0x28   :  { %686 = vmatpush.bf16.msra.mxu2 %v2029_v10  ;;  %v2033_v27 = vld [vmem:[#allocation2 + $0xc8] sm:$0xff]  ;;  %v2032_v31 = vld [vmem:[#allocation2 + $0xc0] sm:$0xff]  ;;  %v2055_v35 = vld [vmem:[#allocation2 + $0x178] sm:$0xff]  ;;  %v136_v40 = vpack.c.bf16 %v128_v33, %v128_v33 }
  0x29   :  { %699 = vmatpush.bf16.msra.mxu3 %v2037_v11  ;;  %v126_v34 = vld [vmem:[%s2536_s0] sm:$0xff]  ;;  %v129_v36 = vld [vmem:[%s2536_s0 + $0x18] sm:$0xff]  ;;  %v127_v37 = vld [vmem:[%s2536_s0 + $0x8] sm:$0xff] }
  0x2a   :  { %661 = vmatpush.bf16.msra.mxu0 %v2012_v12  ;;  %v2063_v38 = vld [vmem:[#allocation2 + $0x1b8] sm:$0xff]  ;;  %v134_v41 = vpack.c.bf16 %v126_v34, %v126_v34  ;;  %v137_v42 = vpack.c.bf16 %v129_v36, %v129_v36  ;;  %v135_v43 = vpack.c.bf16 %v127_v37, %v127_v37  ;;  %v2046_v44 = vld [vmem:[#allocation2 + $0x130] sm:$0xff]  ;;  %v2045_v48 = vld [vmem:[#allocation2 + $0x128] sm:$0xff] }
  0x2b   :  { %674 = vmatpush.bf16.msra.mxu1 %v2020_v13  ;;  %v2071_v39 = vld [vmem:[#allocation2 + $0x1f8] sm:$0xff]  ;;  %v2054_v45 = vld [vmem:[#allocation2 + $0x170] sm:$0xff]  ;;  %v2053_v49 = vld [vmem:[#allocation2 + $0x168] sm:$0xff] }
  0x2c   :  { %687 = vmatpush.bf16.msra.mxu2 %v2028_v14  ;;  %v2062_v46 = vld [vmem:[#allocation2 + $0x1b0] sm:$0xff]  ;;  %v2061_v50 = vld [vmem:[#allocation2 + $0x1a8] sm:$0xff]  ;;  %v2044_v52 = vld [vmem:[#allocation2 + $0x120] sm:$0xff] }
  0x2d   :  { %700 = vmatpush.bf16.msra.mxu3 %v2036_v15  ;;  %v2070_v47 = vld [vmem:[#allocation2 + $0x1f0] sm:$0xff]  ;;  %v2069_v51 = vld [vmem:[#allocation2 + $0x1e8] sm:$0xff]  ;;  %v2052_v53 = vld [vmem:[#allocation2 + $0x160] sm:$0xff] }
  0x2e   :  { %662 = vmatpush.bf16.msra.mxu0 %v2011_v16  ;;  %v2060_v54 = vld [vmem:[#allocation2 + $0x1a0] sm:$0xff]  ;;  %v2043_v56 = vld [vmem:[#allocation2 + $0x118] sm:$0xff]  ;;  %v2042_v60 = vld [vmem:[#allocation2 + $0x110] sm:$0xff] }
  0x2f   :  { %675 = vmatpush.bf16.msra.mxu1 %v2019_v17  ;;  %v2068_v55 = vld [vmem:[#allocation2 + $0x1e0] sm:$0xff]  ;;  %v2051_v57 = vld [vmem:[#allocation2 + $0x158] sm:$0xff]  ;;  %v2050_v61 = vld [vmem:[#allocation2 + $0x150] sm:$0xff] }
  0x30   :  { %688 = vmatpush.bf16.msra.mxu2 %v2027_v18  ;;  %v2059_v58 = vld [vmem:[#allocation2 + $0x198] sm:$0xff]  ;;  %v2058_v62 = vld [vmem:[#allocation2 + $0x190] sm:$0xff]  ;;  %v2041_v0 = vld [vmem:[#allocation2 + $0x108] sm:$0xff] }
  0x31   :  { %701 = vmatpush.bf16.msra.mxu3 %v2035_v19  ;;  %v2067_v59 = vld [vmem:[#allocation2 + $0x1d8] sm:$0xff]  ;;  %v2066_v63 = vld [vmem:[#allocation2 + $0x1d0] sm:$0xff]  ;;  %v2049_v1 = vld [vmem:[#allocation2 + $0x148] sm:$0xff] }
  0x32   :  { %663 = vmatpush.bf16.msra.mxu0 %v2010_v20  ;;  %v2057_v2 = vld [vmem:[#allocation2 + $0x188] sm:$0xff]  ;;  %v2040_v4 = vld [vmem:[#allocation2 + $0x100] sm:$0xff]  ;;  %v132_v10 = vld [vmem:[%s2536_s0 + $0x30] sm:$0xff] }
  0x33   :  { %676 = vmatpush.bf16.msra.mxu1 %v2018_v21  ;;  %v2065_v3 = vld [vmem:[#allocation2 + $0x1c8] sm:$0xff]  ;;  %v2048_v5 = vld [vmem:[#allocation2 + $0x140] sm:$0xff]  ;;  %v133_v11 = vld [vmem:[%s2536_s0 + $0x38] sm:$0xff]  ;;  %v140_v14 = vpack.c.bf16 %v132_v10, %v132_v10 }
  0x34   :  { %689 = vmatpush.bf16.msra.mxu2 %v2026_v22  ;;  %v2056_v6 = vld [vmem:[#allocation2 + $0x180] sm:$0xff]  ;;  %v131_v8 = vld [vmem:[%s2536_s0 + $0x28] sm:$0xff]  ;;  %v141_v15 = vpack.c.bf16 %v133_v11, %v133_v11  ;;  %v2079_v16 = vld [vmem:[%s2540_s4 + $0x38] sm:$0xff] }
  0x35   :  { %702 = vmatpush.bf16.msra.mxu3 %v2034_v23  ;;  %v130_v7 = vld [vmem:[%s2536_s0 + $0x20] sm:$0xff]  ;;  %v139_v13 = vpack.c.bf16 %v131_v8, %v131_v8  ;;  %v2078_v17 = vld [vmem:[%s2540_s4 + $0x30] sm:$0xff]  ;;  %v2077_v18 = vld [vmem:[%s2540_s4 + $0x28] sm:$0xff] }
  0x36   :  { %664 = vmatpush.bf16.msra.mxu0 %v2009_v24  ;;  %v2064_v9 = vld [vmem:[#allocation2 + $0x1c0] sm:$0xff]  ;;  %v138_v12 = vpack.c.bf16 %v130_v7, %v130_v7  ;;  %v2075_v20 = vld [vmem:[%s2540_s4 + $0x18] sm:$0xff]  ;;  %v2074_v22 = vld [vmem:[%s2540_s4 + $0x10] sm:$0xff] }
  0x37   :  { %677 = vmatpush.bf16.msra.mxu1 %v2017_v25  ;;  %v2076_v19 = vld [vmem:[%s2540_s4 + $0x20] sm:$0xff]  ;;  %v2073_v24 = vld [vmem:[%s2540_s4 + $0x8] sm:$0xff]  ;;  %v1988_v7 = vld [vmem:[#allocation11 + $0x1e8] sm:$0xf0] }
  0x38   :  { %690 = vmatpush.bf16.msra.mxu2 %v2025_v26 }
  0x39   :  { %703 = vmatpush.bf16.msra.mxu3 %v2033_v27 }
  0x3a   :  { %665 = vmatpush.bf16.msra.mxu0 %v2008_v28  ;;  %v2072_v28 = vld [vmem:[%s2540_s4] sm:$0xff]  ;;  %s2380_s4 = smov 120  }
  0x3b   :  { %678 = vmatpush.bf16.msra.mxu1 %v2016_v29 }
  0x3c   :  { %691 = vmatpush.bf16.msra.mxu2 %v2024_v30  ;;  %v2159_v30 = vld [vmem:[#allocation5] ss:$0 sm:$0xff] }
  0x3d   :  { %704 = vmatpush.bf16.msra.mxu3 %v2032_v31  ;;  %666 = vmatmul.bf16.vlgmr.msra.gmra.mxu0 %v134_v41 }
  0x3e   :  { %710 = vmatpush.bf16.msrb.mxu0 %v2047_v32  ;;  %679 = vmatmul.bf16.vlgmr.msra.gmra.mxu1 %v135_v43 }
  0x3f   :  { %723 = vmatpush.bf16.msrb.mxu1 %v2055_v35  ;;  %692 = vmatmul.bf16.vlgmr.msra.gmra.mxu2 %v136_v40 }
  0x40   :  { %736 = vmatpush.bf16.msrb.mxu2 %v2063_v38  ;;  %705 = vmatmul.bf16.vlgmr.msra.gmra.mxu3 %v137_v42 }
  0x41   :  { %749 = vmatpush.bf16.msrb.mxu3 %v2071_v39 }
  0x42   :  { %711 = vmatpush.bf16.msrb.mxu0 %v2046_v44 }
  0x43   :  { %724 = vmatpush.bf16.msrb.mxu1 %v2054_v45 }
  0x44   :  { %737 = vmatpush.bf16.msrb.mxu2 %v2062_v46 }
  0x45   :  { %750 = vmatpush.bf16.msrb.mxu3 %v2070_v47 }
  0x46   :  { %712 = vmatpush.bf16.msrb.mxu0 %v2045_v48 }
  0x47   :  { %725 = vmatpush.bf16.msrb.mxu1 %v2053_v49 }
  0x48   :  { %738 = vmatpush.bf16.msrb.mxu2 %v2061_v50 }
  0x49   :  { %751 = vmatpush.bf16.msrb.mxu3 %v2069_v51  ;;  %v875_v51 = vld [vmem:[#allocation8] sm:$0xf] }
  0x4a   :  { %713 = vmatpush.bf16.msrb.mxu0 %v2044_v52  ;;  %v885_v52 = vsel %vm883_vm0, %v875_v51, 0  ;;  %v2113_v51 = vld [vmem:[#allocation11 + $0x10c] sm:$0xf] }
  0x4b   :  { %726 = vmatpush.bf16.msrb.mxu1 %v2052_v53  ;;  %v2160_v53 = vld [vmem:[#allocation7] ss:$0 sm:$0xff] }
  0x4c   :  { %739 = vmatpush.bf16.msrb.mxu2 %v2060_v54 }
  0x4d   :  { %752 = vmatpush.bf16.msrb.mxu3 %v2068_v55 }
  0x4e   :  { %714 = vmatpush.bf16.msrb.mxu0 %v2043_v56 }
  0x4f   :  { %727 = vmatpush.bf16.msrb.mxu1 %v2051_v57 }
  0x50   :  { %740 = vmatpush.bf16.msrb.mxu2 %v2059_v58 }
  0x51   :  { %753 = vmatpush.bf16.msrb.mxu3 %v2067_v59 }
  0x52   :  { %715 = vmatpush.bf16.msrb.mxu0 %v2042_v60 }
  0x53   :  { %728 = vmatpush.bf16.msrb.mxu1 %v2050_v61  ;;  %v1978_v61 = vld [vmem:[#allocation11 + $0x1c0] sm:$0xf] }
  0x54   :  { %741 = vmatpush.bf16.msrb.mxu2 %v2058_v62  ;;  %v2140_v62 = vld [vmem:[#allocation11 + $0x1dc] sm:$0xf0] }
  0x55   :  { %754 = vmatpush.bf16.msrb.mxu3 %v2066_v63  ;;  %v2136_v63 = vld [vmem:[#allocation11 + $0x1c4] sm:$0xf] }
  0x56   :  { %716 = vmatpush.bf16.msrb.mxu0 %v2041_v0  ;;  %v1979_v0 = vor.u32 %v2140_v62, %v1978_v61  ;;  %v1858_v61 = vld [vmem:[#allocation11 + $0xc8] sm:$0xf] }
  0x57   :  { %729 = vmatpush.bf16.msrb.mxu1 %v2049_v1  ;;  %v1980_v1 = vld [vmem:[#allocation11 + $0x1e0] sm:$0xf0]  ;;  %v2109_v62 = vld [vmem:[#allocation11 + $0xe4] sm:$0xf0] }
  0x58   :  { %742 = vmatpush.bf16.msrb.mxu2 %v2057_v2  ;;  %v1986_v2 = vld [vmem:[#allocation11 + $0x1c8] sm:$0xf] }
  0x59   :  { %755 = vmatpush.bf16.msrb.mxu3 %v2065_v3  ;;  %v2141_v3 = vld [vmem:[#allocation11 + $0x1e4] sm:$0xf0] }
  0x5a   :  { %717 = vmatpush.bf16.msrb.mxu0 %v2040_v4  ;;  %v1983_v4 = vor.u32 %v2136_v63, %v1980_v1  ;;  %v2105_v63 = vld [vmem:[#allocation11 + $0xcc] sm:$0xf] }
  0x5b   :  { %730 = vmatpush.bf16.msrb.mxu1 %v2048_v5  ;;  %v1987_v5 = vor.u32 %v2141_v3, %v1986_v2  ;;  %v1859_v3 = vor.u32 %v2109_v62, %v1858_v61 }
  0x5c   :  { %743 = vmatpush.bf16.msrb.mxu2 %v2056_v6  ;;  %v2137_v6 = vld [vmem:[#allocation11 + $0x1cc] sm:$0xf] }
  0x5d   :  { %756 = vmatpush.bf16.msrb.mxu3 %v2064_v9  ;;  %718 = vmatmul.bf16.vlgmr.msrb.gmra.mxu0 %v138_v12  ;;  %v1991_v8 = vor.u32 %v2137_v6, %v1988_v7  ;;  %v848_v9 = vld [vmem:[%s2537_s1] sm:$0xff]  ;;  %v2096_v6 = vld [vmem:[#allocation11 + $0x84] sm:$0xf]  ;;  %s2383_s1 = smov [#allocation13]  }
  0x5e   :  { %731 = vmatmul.bf16.vlgmr.msrb.gmra.mxu1 %v139_v13  ;;  %832 = vmatpush.bf16.msra.mxu0 %v2079_v16  ;;  %s1432_s6 = sshll.u32 %s2383_s1, 4  ;;  %s1433_s6 = int_to_ptr.vmem [resolvable:$true] %s1432_s6 }
  0x5f   :  { %744 = vmatmul.bf16.vlgmr.msrb.gmra.mxu2 %v140_v14  ;;  %894 = vmatpush.bf16.msra.mxu1 %v885_v52  ;;  %v1892_v52 = vld [vmem:[#allocation11 + $0x128] sm:$0xf0] }
  0x60   :  { %757 = vmatmul.bf16.vlgmr.msrb.gmra.mxu3 %v141_v15  ;;  %1304 = vmatpush.bf16.msra.mxu2 %v1979_v0  ;;  %v1860_v0 = vld [vmem:[#allocation11 + $0xe8] sm:$0xf0] }
  0x61   :  { %1317 = vmatpush.bf16.msra.mxu3 %v1983_v4  ;;  %v1818_v4 = vld [vmem:[#allocation11 + $0x80] sm:$0xf]  ;;  %v1863_v7 = vor.u32 %v2105_v63, %v1860_v0  ;;  %v2131_v63 = vld [vmem:[#allocation11 + $0x19c] sm:$0xf] }
  0x62   :  { %833 = vmatpush.bf16.msra.mxu0 %v2078_v17  ;;  %v1972_v0 = vld [vmem:[#allocation11 + $0x1b8] sm:$0xf0] }
  0x63   :  { %1330 = vmatpush.bf16.msrb.mxu1 %v1987_v5  ;;  %v2100_v5 = vld [vmem:[#allocation11 + $0x9c] sm:$0xf0] }
  0x66   :  { %834 = vmatpush.bf16.msra.mxu0 %v2077_v18 }
  0x6a   :  { %835 = vmatpush.bf16.msra.mxu0 %v2076_v19 }
  0x6e   :  { %836 = vmatpush.bf16.msra.mxu0 %v2075_v20  ;;  %v1946_v20 = vld [vmem:[#allocation11 + $0x180] sm:$0xf] }
  0x72   :  { %837 = vmatpush.bf16.msra.mxu0 %v2074_v22  ;;  %v2128_v22 = vld [vmem:[#allocation11 + $0x184] sm:$0xf] }
  0x76   :  { %838 = vmatpush.bf16.msra.mxu0 %v2073_v24  ;;  %v1948_v24 = vld [vmem:[#allocation11 + $0x1a0] sm:$0xf0] }
  0x7a   :  { %839 = vmatpush.bf16.msra.mxu0 %v2072_v28 }
  0x7e   :  { %1343 = vmatpush.bf16.msrb.mxu0 %v1991_v8  ;;  %v1820_v8 = vld [vmem:[#allocation11 + $0xa0] sm:$0xf0] }
  0xba   :  { %v667_v21 = vpop.f32.mrf.mxu0 }
  0xbb   :  { %v680_v23 = vpop.f32.mrf.mxu1  ;;  %v668_v33 = vadd.f32 %v2159_v30, %v667_v21  ;;  %v2132_v21 = vld [vmem:[#allocation11 + $0x19c] sm:$0xf0]  ;;  %v1956_v30 = vld [vmem:[#allocation11 + $0x1a8] sm:$0xf0] }
  0xbd   :  { %v681_v34 = vadd.f32 %v680_v23, %v668_v33  ;;  %v1947_v23 = vor.u32 %v2132_v21, %v1946_v20  ;;  %v2124_v33 = vld [vmem:[#allocation11 + $0x15c] sm:$0xf0]  ;;  %v1788_v20 = vld [vmem:[#allocation11 + $0x60] sm:$0xf0]  ;;  %v1794_v21 = vld [vmem:[#allocation11 + $0x48] sm:$0xf] }
  0xbf   :  { %1305 = vmatpush.bf16.msra.mxu2 %v1947_v23  ;;  %v2089_v23 = vld [vmem:[#allocation11 + $0x4c] sm:$0xf] }
  0xc2   :  { %v693_v25 = vpop.f32.mrf.mxu2  ;;  %v669_v27 = vpop.f32.mrf.mxu0 }
  0xc3   :  { %v706_v26 = vpop.f32.mrf.mxu3  ;;  %v682_v29 = vpop.f32.mrf.mxu1  ;;  %v694_v35 = vadd.f32 %v693_v25, %v681_v34  ;;  %v1954_v25 = vld [vmem:[#allocation11 + $0x188] sm:$0xf]  ;;  %v1951_v27 = vor.u32 %v2128_v22, %v1948_v24  ;;  %v2120_v34 = vld [vmem:[#allocation11 + $0x144] sm:$0xf]  ;;  %v1796_v24 = vld [vmem:[#allocation11 + $0x68] sm:$0xf0] }
  0xc4   :  { %v2129_v29 = vld [vmem:[#allocation11 + $0x18c] sm:$0xf]  ;;  %v2093_v22 = vld [vmem:[#allocation11 + $0x64] sm:$0xf0] }
  0xc5   :  { %v707_v36 = vadd.f32 %v706_v26, %v694_v35  ;;  %v2133_v26 = vld [vmem:[#allocation11 + $0x1a4] sm:$0xf0]  ;;  %v1916_v35 = vld [vmem:[#allocation11 + $0x160] sm:$0xf0]  ;;  %1318 = vmatpush.bf16.msra.mxu3 %v1951_v27  ;;  %v2084_v27 = vld [vmem:[#allocation11 + $0x1c] sm:$0xf0] }
  0xc6   :  { %v1955_v28 = vor.u32 %v2133_v26, %v1954_v25  ;;  %v1754_v26 = vld [vmem:[#allocation11] sm:$0xf] }
  0xc8   :  { %1331 = vmatpush.bf16.msrb.mxu1 %v1955_v28 }
  0xca   :  { %v695_v31 = vpop.f32.mrf.mxu2 }
  0xcb   :  { %v708_v32 = vpop.f32.mrf.mxu3  ;;  %v1914_v31 = vld [vmem:[#allocation11 + $0x140] sm:$0xf] }
  0xcc   :  { %v1959_v32 = vor.u32 %v2129_v29, %v1956_v30  ;;  %v1795_v29 = vor.u32 %v2093_v22, %v1794_v21  ;;  %v2080_v30 = vld [vmem:[#allocation11 + $0x4] sm:$0xf] }
  0xce   :  { %1344 = vmatpush.bf16.msrb.mxu0 %v1959_v32  ;;  %v1762_v32 = vld [vmem:[#allocation11 + $0x8] sm:$0xf] }
  0xda   :  { %v719_v37 = vpop.f32.mrf.mxu0 }
  0xdb   :  { %v732_v38 = vpop.f32.mrf.mxu1  ;;  %v720_v39 = vadd.f32 %v719_v37, %v707_v36  ;;  %v1915_v36 = vor.u32 %v2124_v33, %v1914_v31  ;;  %v1919_v37 = vor.u32 %v2120_v34, %v1916_v35  ;;  %v1756_v31 = vld [vmem:[#allocation11 + $0x20] sm:$0xf0]  ;;  %v1799_v33 = vor.u32 %v2089_v23, %v1796_v24  ;;  %v2085_v34 = vld [vmem:[#allocation11 + $0x24] sm:$0xf0]  ;;  %v2081_v35 = vld [vmem:[#allocation11 + $0xc] sm:$0xf] }
  0xdc   :  { %v2115_v23 = vld [vmem:[#allocation11 + $0x11c] sm:$0xf] }
  0xdd   :  { %v733_v40 = vadd.f32 %v732_v38, %v720_v39  ;;  %v1922_v38 = vld [vmem:[#allocation11 + $0x148] sm:$0xf]  ;;  %1306 = vmatpush.bf16.msra.mxu2 %v1915_v36  ;;  %1319 = vmatpush.bf16.msra.mxu3 %v1919_v37  ;;  %v1764_v36 = vld [vmem:[#allocation11 + $0x28] sm:$0xf0]  ;;  %v1994_v37 = vld [vmem:[#allocation11 + $0x1d0] sm:$0xf] }
  0xde   :  { %v2125_v39 = vld [vmem:[#allocation11 + $0x164] sm:$0xf0]  ;;  %v1908_v24 = vld [vmem:[#allocation11 + $0x138] sm:$0xf0] }
  0xe2   :  { %v745_v41 = vpop.f32.mrf.mxu2  ;;  %v721_v44 = vpop.f32.mrf.mxu0 }
  0xe3   :  { %v758_v42 = vpop.f32.mrf.mxu3  ;;  %v746_v43 = vadd.f32 %v745_v41, %v733_v40  ;;  %v734_v45 = vpop.f32.mrf.mxu1  ;;  %v2121_v40 = vld [vmem:[#allocation11 + $0x14c] sm:$0xf]  ;;  %v1923_v41 = vor.u32 %v2125_v39, %v1922_v38  ;;  %v2116_v44 = vld [vmem:[#allocation11 + $0x11c] sm:$0xf0]  ;;  %v2142_v38 = vld [vmem:[#allocation11 + $0x1ec] sm:$0xf0] }
  0xe4   :  { %v2138_v39 = vld [vmem:[#allocation11 + $0x1d4] sm:$0xf] }
  0xe5   :  { %v759_v46 = vadd.f32 %v758_v42, %v746_v43  ;;  %v1924_v42 = vld [vmem:[#allocation11 + $0x168] sm:$0xf0]  ;;  %v1882_v43 = vld [vmem:[#allocation11 + $0x100] sm:$0xf]  ;;  %1332 = vmatpush.bf16.msrb.mxu1 %v1923_v41  ;;  %v1996_v41 = vld [vmem:[#allocation11 + $0x1f0] sm:$0xf0] }
  0xe6   :  { %v1927_v45 = vor.u32 %v2121_v40, %v1924_v42  ;;  %v1755_v40 = vor.u32 %v2084_v27, %v1754_v26  ;;  %v2002_v42 = vld [vmem:[#allocation11 + $0x1d8] sm:$0xf]  ;;  %v1866_v26 = vld [vmem:[#allocation11 + $0xd0] sm:$0xf] }
  0xe7   :  { %v762_v47 = vmax.f32 %v759_v46, 0.0  ;;  %v2112_v46 = vld [vmem:[#allocation11 + $0x104] sm:$0xf]  ;;  %v2110_v27 = vld [vmem:[#allocation11 + $0xec] sm:$0xf0] }
  0xe8   :  { %1345 = vmatpush.bf16.msrb.mxu0 %v1927_v45  ;;  %v1763_v45 = vor.u32 %v2085_v34, %v1762_v32  ;;  %v2111_v32 = vld [vmem:[#allocation11 + $0xf4] sm:$0xf0] }
  0xe9   :  { %v763_v48 = vpack.c.bf16 %v762_v47, %v762_v47  ;;  %v1884_v47 = vld [vmem:[#allocation11 + $0x120] sm:$0xf0] }
  0xea   :  { %v747_v49 = vpop.f32.mrf.mxu2 }
  0xeb   :  { %v760_v50 = vpop.f32.mrf.mxu3  ;;  %840 = vmatmul.bf16.vlgmr.msra.gmra.mxu0 %v763_v48  ;;  %v1890_v48 = vld [vmem:[#allocation11 + $0x108] sm:$0xf]  ;;  %v1883_v49 = vor.u32 %v2116_v44, %v1882_v43  ;;  %v2143_v43 = vld [vmem:[#allocation11 + $0x1f4] sm:$0xf0]  ;;  %v1759_v44 = vor.u32 %v2080_v30, %v1756_v31  ;;  %v1868_v30 = vld [vmem:[#allocation11 + $0xf0] sm:$0xf0] }
  0xec   :  { %v2117_v50 = vld [vmem:[#allocation11 + $0x124] sm:$0xf0]  ;;  %v1874_v31 = vld [vmem:[#allocation11 + $0xd8] sm:$0xf] }
  0xed   :  { %1307 = vmatpush.bf16.msra.mxu2 %v1883_v49  ;;  %v1995_v49 = vor.u32 %v2142_v38, %v1994_v37  ;;  %v1875_v34 = vor.u32 %v2111_v32, %v1874_v31  ;;  %v1834_v37 = vld [vmem:[#allocation11 + $0x90] sm:$0xf] }
 0x168   :  { %v841_v54 = vpop.f32.mrf.mxu0 }
 0x169   :  { %v2511_v55 = vadd.f32 %v2160_v53, %v841_v54  ;;  %v1887_v53 = vor.u32 %v2112_v46, %v1884_v47  ;;  %v1891_v54 = vor.u32 %v2117_v50, %v1890_v48  ;;  %v2139_v46 = vld [vmem:[#allocation11 + $0x1dc] sm:$0xf]  ;;  %v1767_v48 = vor.u32 %v2081_v35, %v1764_v36 }
 0x16a   :  { %v2004_v47 = vld [vmem:[#allocation11 + $0x1f8] sm:$0xf0]  ;;  %v1999_v50 = vor.u32 %v2138_v39, %v1996_v41  ;;  %v2102_v39 = vld [vmem:[#allocation11 + $0xac] sm:$0xf0]  ;;  %v1836_v41 = vld [vmem:[#allocation11 + $0xb0] sm:$0xf0] }
 0x16b   :  { %v845_v56 = vmul.f32 0.5, %v2511_v55  ;;  %v856_v60 = vmul.f32 %v2511_v55, %v2511_v55  ;;  %v862_v11 = vmul.f32 1.442695, %v2511_v55  ;;  %v855_v15 = vadd.f32 1.0, %v2511_v55  ;;  %1320 = vmatpush.bf16.msra.mxu3 %v1887_v53  ;;  %1333 = vmatpush.bf16.msrb.mxu1 %v1891_v54  ;;  %v1962_v53 = vld [vmem:[#allocation11 + $0x190] sm:$0xf] }
 0x16c   :  { %v2134_v54 = vld [vmem:[#allocation11 + $0x1ac] sm:$0xf0]  ;;  %v2107_v35 = vld [vmem:[#allocation11 + $0xdc] sm:$0xf] }
 0x16d   :  { %v846_v57 = vmul.f32 1.442695, %v845_v56  ;;  %v1850_v56 = vld [vmem:[#allocation11 + $0xc0] sm:$0xf]  ;;  %v1876_v36 = vld [vmem:[#allocation11 + $0xf8] sm:$0xf0] }
 0x16e   :  { %v1879_v38 = vor.u32 %v2107_v35, %v1876_v36 }
 0x16f   :  { %2162 = vpow2.f32 %v846_v57  ;;  %v2108_v57 = vld [vmem:[#allocation11 + $0xdc] sm:$0xf0]  ;;  %1334 = vmatpush.bf16.msrb.mxu1 %v1859_v3  ;;  %v2126_v3 = vld [vmem:[#allocation11 + $0x16c] sm:$0xf0] }
 0x170   :  { %v843_v58 = vpop.f32.mrf.mxu0  ;;  %2164 = vpow2.f32 %v862_v11  ;;  %v1851_v1 = vor.u32 %v2108_v57, %v1850_v56  ;;  %v2097_v11 = vld [vmem:[#allocation11 + $0x8c] sm:$0xf]  ;;  %v2130_v56 = vld [vmem:[#allocation11 + $0x194] sm:$0xf]  ;;  %v1963_v57 = vor.u32 %v2134_v54, %v1962_v53  ;;  %v1810_v54 = vld [vmem:[#allocation11 + $0x58] sm:$0xf] }
 0x171   :  { %v2104_v58 = vld [vmem:[#allocation11 + $0xc4] sm:$0xf]  ;;  %v1804_v53 = vld [vmem:[#allocation11 + $0x70] sm:$0xf0] }
 0x172   :  { %1308 = vmatpush.bf16.msra.mxu2 %v1851_v1  ;;  %v1975_v1 = vor.u32 %v2131_v63, %v1972_v0  ;;  %v2086_v63 = vld [vmem:[#allocation11 + $0x2c] sm:$0xf0]  ;;  %v2082_v0 = vld [vmem:[#allocation11 + $0x14] sm:$0xf] }
 0x175   :  { %v2163_v59 = vpop.eup %2162 }
 0x176   :  { %850 = vrot.lane.b32.xlu0 %v2163_v59, %s2380_s4  ;;  %v2165_v18 = vpop.eup %2164  ;;  %v1895_v59 = vor.u32 %v2113_v51, %v1892_v52  ;;  %v2003_v51 = vor.u32 %v2143_v43, %v2002_v42  ;;  %v2007_v52 = vor.u32 %v2139_v46, %v2004_v47  ;;  %v1835_v42 = vor.u32 %v2102_v39, %v1834_v37  ;;  %v2099_v46 = vld [vmem:[#allocation11 + $0x9c] sm:$0xf] }
 0x178   :  { %1346 = vmatpush.bf16.msrb.mxu0 %v1895_v59  ;;  %v1970_v59 = vld [vmem:[#allocation11 + $0x198] sm:$0xf] }
 0x17c   :  { %1347 = vmatpush.bf16.msrb.mxu0 %v1863_v7  ;;  %v1938_v7 = vld [vmem:[#allocation11 + $0x158] sm:$0xf] }
 0x17e   :  { %858 = vrot.lane.b32.xlu0 %v856_v60, %s2381_s12  ;;  %v1852_v60 = vld [vmem:[#allocation11 + $0xe0] sm:$0xf0] }
 0x17f   :  { %v1855_v2 = vor.u32 %v2104_v58, %v1852_v60  ;;  %v1964_v58 = vld [vmem:[#allocation11 + $0x1b0] sm:$0xf0]  ;;  %v2135_v60 = vld [vmem:[#allocation11 + $0x1b4] sm:$0xf0] }
 0x180   :  { %v1967_v61 = vor.u32 %v2130_v56, %v1964_v58  ;;  %v1971_v62 = vor.u32 %v2135_v60, %v1970_v59  ;;  %v2091_v58 = vld [vmem:[#allocation11 + $0x5c] sm:$0xf] }
 0x181   :  { %1321 = vmatpush.bf16.msra.mxu3 %v1855_v2  ;;  %v1930_v2 = vld [vmem:[#allocation11 + $0x150] sm:$0xf]  ;;  %v1812_v59 = vld [vmem:[#allocation11 + $0x78] sm:$0xf0] }
 0x1e8   :  { %v851_v10 = vpop.permute.xlu0 %850 }
 0x1e9   :  { %v853_v12 = vmul.f32 %v851_v10, %v848_v9  ;;  %v1826_v9 = vld [vmem:[#allocation11 + $0x88] sm:$0xf] }
 0x1ea   :  { %v2101_v10 = vld [vmem:[#allocation11 + $0xa4] sm:$0xf0] }
 0x1eb   :  { %v854_v13 = vadd.f32 %v853_v12, %v2511_v55  ;;  %v1828_v12 = vld [vmem:[#allocation11 + $0xa8] sm:$0xf0] }
 0x1ed   :  { %1417 = vrot.lane.b32.xlu2 %v854_v13, %s2382_s15  ;;  %v874_v14 = vpack.c.bf16 %v854_v13, %v854_v13  ;;  %v1819_v13 = vor.u32 %v2100_v5, %v1818_v4  ;;  %v1931_v4 = vor.u32 %v2126_v3, %v1930_v2  ;;  %v2122_v5 = vld [vmem:[#allocation11 + $0x154] sm:$0xf]  ;;  %v1778_v3 = vld [vmem:[#allocation11 + $0x18] sm:$0xf] }
 0x1ee   :  { %v1772_v2 = vld [vmem:[#allocation11 + $0x30] sm:$0xf0] }
 0x1ef   :  { %1751 = vmatmul.msk.bf16.vlgmr.msra.gmra.mxu1 %vm869_vm1, %v874_v14  ;;  %v1823_v14 = vor.u32 %v2096_v6, %v1820_v8  ;;  %1309 = vmatpush.bf16.msra.mxu2 %v1819_v13  ;;  %v1932_v6 = vld [vmem:[#allocation11 + $0x170] sm:$0xf0] }
 0x1f0   :  { %v859_v16 = vpop.permute.xlu0 %858  ;;  %v1935_v8 = vor.u32 %v2122_v5, %v1932_v6  ;;  %v2083_v5 = vld [vmem:[#allocation11 + $0x1c] sm:$0xf] }
 0x1f1   :  { %v861_v17 = vsub.f32 %v855_v15, %v859_v16  ;;  %v1827_v15 = vor.u32 %v2101_v10, %v1826_v9  ;;  %v1786_v16 = vld [vmem:[#allocation11 + $0x40] sm:$0xf]  ;;  %1322 = vmatpush.bf16.msra.mxu3 %v1823_v14  ;;  %v2127_v9 = vld [vmem:[#allocation11 + $0x174] sm:$0xf0]  ;;  %v2123_v10 = vld [vmem:[#allocation11 + $0x15c] sm:$0xf] }
 0x1f2   :  { %v1898_v14 = vld [vmem:[#allocation11 + $0x110] sm:$0xf]  ;;  %v1780_v6 = vld [vmem:[#allocation11 + $0x38] sm:$0xf0] }
 0x1f3   :  { %v864_v19 = vsub.f32 %v861_v17, %v2165_v18  ;;  %v2092_v17 = vld [vmem:[#allocation11 + $0x5c] sm:$0xf0]  ;;  %v2088_v18 = vld [vmem:[#allocation11 + $0x44] sm:$0xf]  ;;  %1335 = vmatpush.bf16.msrb.mxu1 %v1827_v15  ;;  %v2118_v15 = vld [vmem:[#allocation11 + $0x12c] sm:$0xf0] }
 0x1f4   :  { %v1787_v25 = vor.u32 %v2092_v17, %v1786_v16  ;;  %v1791_v28 = vor.u32 %v2088_v18, %v1788_v20  ;;  %v2114_v16 = vld [vmem:[#allocation11 + $0x114] sm:$0xf]  ;;  %v1899_v17 = vor.u32 %v2118_v15, %v1898_v14  ;;  %v2119_v20 = vld [vmem:[#allocation11 + $0x134] sm:$0xf0] }
 0x1f5   :  { %866 = vrot.lane.b32.xlu1 %v864_v19, %s2380_s4  ;;  %v1831_v19 = vor.u32 %v2097_v11, %v1828_v12  ;;  %v1940_v11 = vld [vmem:[#allocation11 + $0x178] sm:$0xf0]  ;;  %v1939_v12 = vor.u32 %v2127_v9, %v1938_v7  ;;  %v1900_v18 = vld [vmem:[#allocation11 + $0x130] sm:$0xf0] }
 0x1f6   :  { %1310 = vmatpush.bf16.msra.mxu2 %v1787_v25  ;;  %1323 = vmatpush.bf16.msra.mxu3 %v1791_v28  ;;  %v1943_v13 = vor.u32 %v2123_v10, %v1940_v11  ;;  %v1903_v21 = vor.u32 %v2114_v16, %v1900_v18  ;;  %v1911_v25 = vor.u32 %v2115_v23, %v1908_v24  ;;  %v2106_v28 = vld [vmem:[#allocation11 + $0xd4] sm:$0xf] }
 0x1f7   :  { %1348 = vmatpush.bf16.msrb.mxu0 %v1831_v19  ;;  %1336 = vmatpush.bf16.msrb.mxu1 %v1795_v29  ;;  %v1906_v19 = vld [vmem:[#allocation11 + $0x118] sm:$0xf]  ;;  %v1867_v29 = vor.u32 %v2110_v27, %v1866_v26  ;;  %v1783_v10 = vor.u32 %v2083_v5, %v1780_v6 }
 0x1f8   :  { %v1907_v22 = vor.u32 %v2119_v20, %v1906_v19 }
 0x1fa   :  { %1311 = vmatpush.bf16.msra.mxu2 %v1755_v40  ;;  %1324 = vmatpush.bf16.msra.mxu3 %v1759_v44  ;;  %v2098_v40 = vld [vmem:[#allocation11 + $0x94] sm:$0xf]  ;;  %v1842_v44 = vld [vmem:[#allocation11 + $0x98] sm:$0xf] }
 0x1fb   :  { %1349 = vmatpush.bf16.msrb.mxu0 %v1799_v33  ;;  %1337 = vmatpush.bf16.msrb.mxu1 %v1763_v45  ;;  %v1871_v33 = vor.u32 %v2106_v28, %v1868_v30  ;;  %v1839_v43 = vor.u32 %v2098_v40, %v1836_v41  ;;  %v2103_v45 = vld [vmem:[#allocation11 + $0xb4] sm:$0xf0] }
 0x1fc   :  { %v1843_v47 = vor.u32 %v2103_v45, %v1842_v44 }
 0x1fe   :  { %1356 = vmatpush.bf16.msrb.mxu2 %v1995_v49  ;;  %1369 = vmatpush.bf16.msrb.mxu3 %v1999_v50  ;;  %v1802_v49 = vld [vmem:[#allocation11 + $0x50] sm:$0xf] }
 0x1ff   :  { %1350 = vmatpush.bf16.msrb.mxu0 %v1767_v48  ;;  %1382 = vmatpush.bf16.msra.mxu1 %v2003_v51  ;;  %v1844_v48 = vld [vmem:[#allocation11 + $0xb8] sm:$0xf0]  ;;  %v2094_v50 = vld [vmem:[#allocation11 + $0x6c] sm:$0xf0] }
 0x200   :  { %v1847_v51 = vor.u32 %v2099_v46, %v1844_v48  ;;  %v1803_v56 = vor.u32 %v2094_v50, %v1802_v49 }
 0x202   :  { %1357 = vmatpush.bf16.msrb.mxu2 %v1963_v57  ;;  %1370 = vmatpush.bf16.msrb.mxu3 %v1967_v61  ;;  %v2095_v57 = vld [vmem:[#allocation11 + $0x74] sm:$0xf0] }
 0x203   :  { %1395 = vmatpush.bf16.msra.mxu0 %v2007_v52  ;;  %1383 = vmatpush.bf16.msra.mxu1 %v1971_v62  ;;  %v2090_v52 = vld [vmem:[#allocation11 + $0x54] sm:$0xf]  ;;  %v1811_v61 = vor.u32 %v2095_v57, %v1810_v54  ;;  %v1770_v62 = vld [vmem:[#allocation11 + $0x10] sm:$0xf] }
 0x204   :  { %v1807_v60 = vor.u32 %v2090_v52, %v1804_v53  ;;  %v1771_v7 = vor.u32 %v2086_v63, %v1770_v62 }
 0x206   :  { %1358 = vmatpush.bf16.msrb.mxu2 %v1931_v4  ;;  %1371 = vmatpush.bf16.msrb.mxu3 %v1935_v8  ;;  %v2087_v4 = vld [vmem:[#allocation11 + $0x34] sm:$0xf0]  ;;  %v1775_v8 = vor.u32 %v2082_v0, %v1772_v2 }
 0x207   :  { %1396 = vmatpush.bf16.msra.mxu0 %v1975_v1  ;;  %1384 = vmatpush.bf16.msra.mxu1 %v1939_v12  ;;  %v1815_v1 = vor.u32 %v2091_v58, %v1812_v59  ;;  %v1779_v9 = vor.u32 %v2087_v4, %v1778_v3 }
 0x20a   :  { %1359 = vmatpush.bf16.msrb.mxu2 %v1899_v17  ;;  %1372 = vmatpush.bf16.msrb.mxu3 %v1903_v21 }
 0x20b   :  { %1397 = vmatpush.bf16.msra.mxu0 %v1943_v13  ;;  %1385 = vmatpush.bf16.msra.mxu1 %v1907_v22  ;;  %v2161_v13 = vld [vmem:[#allocation10] ss:$0 sm:$0xff] }
 0x20e   :  { %1360 = vmatpush.bf16.msrb.mxu2 %v1867_v29  ;;  %1373 = vmatpush.bf16.msrb.mxu3 %v1871_v33 }
 0x20f   :  { %1398 = vmatpush.bf16.msra.mxu0 %v1911_v25  ;;  %1386 = vmatpush.bf16.msra.mxu1 %v1875_v34  ;;  %v966_v25 = vld [vmem:[%s2545_s9] sm:$0xff]  ;;  %s2384_s9 = smov [#allocation14]  }
 0x210   :  { %v970_v26 = vperm.slane %v966_v25, 2  ;;  %v971_v27 = vperm.slane %v966_v25, 3  ;;  %v968_v32 = vperm.slane %v966_v25, 0  ;;  %v969_v33 = vperm.slane %v966_v25, 1  ;;  %s1443_s10 = sshll.u32 %s2384_s9, 4  ;;  %s1444_s10 = int_to_ptr.vmem [resolvable:$true] %s1443_s10 }
 0x211   :  { %v974_v41 = vperm.slane %v966_v25, 6  ;;  %v973_v48 = vperm.slane %v966_v25, 5 }
 0x212   :  { %1361 = vmatpush.bf16.msrb.mxu2 %v1835_v42  ;;  %1374 = vmatpush.bf16.msrb.mxu3 %v1839_v43  ;;  %v975_v42 = vperm.slane %v966_v25, 7 }
 0x213   :  { %1399 = vmatpush.bf16.msra.mxu0 %v1879_v38  ;;  %1387 = vmatpush.bf16.msra.mxu1 %v1843_v47  ;;  %v972_v47 = vperm.slane %v966_v25, 4 }
 0x216   :  { %1362 = vmatpush.bf16.msrb.mxu2 %v1803_v56  ;;  %1375 = vmatpush.bf16.msrb.mxu3 %v1807_v60 }
 0x217   :  { %1400 = vmatpush.bf16.msra.mxu0 %v1847_v51  ;;  %1388 = vmatpush.bf16.msra.mxu1 %v1811_v61 }
 0x21a   :  { %1363 = vmatpush.bf16.msrb.mxu2 %v1771_v7  ;;  %1376 = vmatpush.bf16.msrb.mxu3 %v1775_v8 }
 0x21b   :  { %1401 = vmatpush.bf16.msra.mxu0 %v1815_v1  ;;  %1389 = vmatpush.bf16.msra.mxu1 %v1779_v9 }
 0x21f   :  { %1402 = vmatpush.bf16.msra.mxu0 %v1783_v10 }
 0x247   :  { %v1418_v19 = vpop.permute.xlu2 %1417 }
 0x248   :  { %v1421_v22 = vsel %vm1420_vm2, %v2511_v55, %v1418_v19 }
 0x267   :  { %v867_v11 = vpop.permute.xlu1 %866 }
 0x268   :  { %v870_v12 = vsel %vm869_vm1, %v867_v11, 0.0 }
 0x269   :  { %871 = vadd.xlane.f32.xlu1 %v870_v12 }
 0x26c   :  { %v896_v14 = vpop.f32.mrf.mxu1 }
 0x26d   :  { %v897_v15 = vadd.f32 %v2161_v13, %v896_v14 }
 0x26f   :  { %v900_v16 = vmax.f32 %v897_v15, 0.0 }
 0x271   :  { %v901_v17 = vpack.c.bf16 %v900_v16, %v900_v16 }
 0x273   :  { %1312 = vmatmul.bf16.vlgmr.msra.gmra.mxu2 %v901_v17  ;;  %1325 = vmatmul.bf16.vlgmr.msra.gmra.mxu3 %v901_v17 }
 0x274   :  { %1338 = vmatmul.bf16.vlgmr.msrb.gmra.mxu1 %v901_v17  ;;  %1351 = vmatmul.bf16.vlgmr.msrb.gmra.mxu0 %v901_v17  ;;  %v898_v18 = vpop.f32.mrf.mxu1 }
 0x283   :  { %1364 = vmatmul.bf16.vlgmr.msrb.gmra.mxu2 %v901_v17  ;;  %1377 = vmatmul.bf16.vlgmr.msrb.gmra.mxu3 %v901_v17 }
 0x284   :  { %1390 = vmatmul.bf16.vlgmr.msra.gmra.mxu1 %v901_v17  ;;  %1403 = vmatmul.bf16.vlgmr.msra.gmra.mxu0 %v901_v17 }
 0x2dc   :  { %v872_v20 = vpop.xlane.xlu1 %871 }
 0x2dd   :  { %v873_v21 = vmul.f32 -0.5, %v872_v20 }
 0x2df   :  { %v1423_v23 = vsel %vm1422_vm3, %v1421_v22, %v873_v21 }
 0x2e0   :  { %v1425_v24 = vsel %vm1424_vm4, %v1423_v23, 0.0 }
 0x2e1   :  { %1426 = vst [vmem:[#allocation13] sm:$0xff] %v1425_v24 }
 0x2e2   :  { %1437 = dma.vmem_to_hbm [thread:$0]  %s1433_s6, 128, %s1435_s18, [#allocation4]  }
 0x2f1   :  { %v1339_v28 = vpop.f32.mrf.mxu1  ;;  %v1352_v29 = vpop.f32.mrf.mxu0 }
 0x2f2   :  { %v1340_v30 = vadd.f32 %v1339_v28, %v970_v26  ;;  %v1353_v31 = vadd.f32 %v1352_v29, %v971_v27 }
 0x2f4   :  { %1410 = vst [vmem:[#allocation14 + $0x10] sm:$0xff] %v1340_v30 }
 0x2f5   :  { %1411 = vst [vmem:[#allocation14 + $0x18] sm:$0xff] %v1353_v31 }
 0x2f6   :  { %v1313_v55 = vpop.f32.mrf.mxu2  ;;  %v1326_v34 = vpop.f32.mrf.mxu3 }
 0x2f7   :  { %v1314_v35 = vadd.f32 %v1313_v55, %v968_v32  ;;  %v1327_v36 = vadd.f32 %v1326_v34, %v969_v33 }
 0x2f9   :  { %1408 = vst [vmem:[#allocation14] sm:$0xff] %v1314_v35  ;;  %v1341_v37 = vpop.f32.mrf.mxu1  ;;  %v1354_v38 = vpop.f32.mrf.mxu0 }
 0x2fa   :  { %1409 = vst [vmem:[#allocation14 + $0x8] sm:$0xff] %v1327_v36 }
 0x2fe   :  { %v1315_v39 = vpop.f32.mrf.mxu2  ;;  %v1328_v40 = vpop.f32.mrf.mxu3 }
 0x301   :  { %v1391_v43 = vpop.f32.mrf.mxu1  ;;  %v1404_v44 = vpop.f32.mrf.mxu0 }
 0x302   :  { %v1392_v45 = vadd.f32 %v1391_v43, %v974_v41  ;;  %v1405_v46 = vadd.f32 %v1404_v44, %v975_v42 }
 0x304   :  { %1414 = vst [vmem:[#allocation14 + $0x30] sm:$0xff] %v1392_v45 }
 0x305   :  { %1415 = vst [vmem:[#allocation14 + $0x38] sm:$0xff] %v1405_v46 }
 0x306   :  { %v1365_v49 = vpop.f32.mrf.mxu2  ;;  %v1378_v50 = vpop.f32.mrf.mxu3 }
 0x307   :  { %v1366_v51 = vadd.f32 %v1365_v49, %v972_v47  ;;  %v1379_v52 = vadd.f32 %v1378_v50, %v973_v48 }
 0x309   :  { %1412 = vst [vmem:[#allocation14 + $0x20] sm:$0xff] %v1366_v51  ;;  %v1393_v53 = vpop.f32.mrf.mxu1  ;;  %v1406_v54 = vpop.f32.mrf.mxu0 }
 0x30a   :  { %1413 = vst [vmem:[#allocation14 + $0x28] sm:$0xff] %v1379_v52 }
 0x30b   :  { %1448 = dma.vmem_to_hbm [thread:$0]  %s1444_s10, 1024, %s1446_s22, [#allocation15]  }
 0x30e   :  { %v1367_v56 = vpop.f32.mrf.mxu2  ;;  %v1380_v57 = vpop.f32.mrf.mxu3 }
 0x30f   :  { %2366 = dma.done.wait [#allocation4], 128  }
 0x310   :  { %2367 = vsyncadd [#allocation4], 4294967168 }
 0x311   :  { %2368 = dma.done.wait [#allocation15], 1024  }
 0x312   :  { %2369 = vsyncadd [#allocation15], 4294966272 }
 0x313   :  { %1457 = vsyncpa [#allocation3], 1 }
 0x314   :  { %1458 = vsyncpa [#allocation6], 1 }
 0x315   :  { %1459 = vsyncpa [#allocation9], 1 }
 0x316   :  { %1460 = vsyncpa [#allocation12], 1 }
 0x317   :  { %1461 = vsyncpa [#allocation4], 1 }
 0x318   :  { %1462 = vsyncpa [#allocation15], 1 }

</bundles_post_ra>
